<compile_context>
chip_gen: v6e
topology: v6e:2x2x1
jax: 0.10.0
libtpu: 0.0.40
codegen_flags: <defaults>
</compile_context>

<pallas_src>
import numpy as np
import jax
import jax.numpy as jnp
from jax.experimental import pallas as pl
from jax.experimental.pallas import tpu as pltpu


def build_mask2d(pooling_counts, N):
    """Replicates SparseBoundaryCat.__init__ mask construction (host-side)."""
    mask2d = np.zeros((N, N), dtype=bool)
    mask2d[np.arange(N), np.arange(N)] = True
    stride, offset = 1, 0
    for c in pooling_counts:
        for _ in range(c):
            offset += stride
            i = np.arange(0, N - offset)
            j = np.arange(offset, N)
            mask2d[i, j] = True
        stride *= 2
    return mask2d


# ----------------------------------------------------------------------------
# Kernels
# ----------------------------------------------------------------------------

def _dense_kernel(start_ref, end_ref, mask_ref, out_ref):
    """N % 128 == 0: (..., N, N) stores are already lane-dense."""
    s = start_ref[0]                       # (tD, N)
    e = end_ref[0]                         # (tD, N)
    m = mask_ref[...]                      # (N, N), 0/1 in input dtype
    # start[d, i] broadcast over columns j; end[d, j] broadcast over rows i.
    out_ref[0, 0] = (s[:, :, None] * m[None, :, :]).astype(out_ref.dtype)
    out_ref[0, 1] = (e[:, None, :] * m[None, :, :]).astype(out_ref.dtype)


def _flat_kernel(start_ref, end_ref, rowsel_ref, colsel_ref, out_ref):
    """N < 128: write lane-dense (tD, N*N) slabs.

    rowsel[i, i*N + j] = mask[i, j] and colsel[j, i*N + j] = mask[i, j], so a
    single MXU matmul realizes broadcast + masking with exactly one nonzero
    term per output element (exact at HIGHEST precision).
    """
    s = start_ref[0]                       # (tD, N)
    e = end_ref[0]                         # (tD, N)
    hi = jax.lax.Precision.HIGHEST
    sm = jnp.dot(s, rowsel_ref[...], preferred_element_type=jnp.float32,
                 precision=hi)             # (tD, N*N)
    em = jnp.dot(e, colsel_ref[...], preferred_element_type=jnp.float32,
                 precision=hi)             # (tD, N*N)
    out_ref[0, 0] = sm.astype(out_ref.dtype)
    out_ref[0, 1] = em.astype(out_ref.dtype)


# ----------------------------------------------------------------------------
# Tiling / VMEM sizing helpers
# ----------------------------------------------------------------------------

def _vmem_limit_bytes():
    """Per-generation scoped-VMEM limit (v7x: 64 MiB physical; v5e/v6e: 128)."""
    try:
        cap = int(pltpu.get_tpu_info().vmem_capacity_bytes)
    except Exception:
        cap = 64 << 20
    return int(min(cap * 3 // 4, 96 << 20))


def _choose_tile_d(D, N, in_itemsize, out_itemsize, vmem_limit, fixed_bytes,
                   sub_mult):
    """Largest tD (multiple of sub_mult dividing D, or D itself) such that the
    double-buffered output/input blocks plus in-kernel intermediates fit."""
    per_td = (4 * out_itemsize + 2 * in_itemsize) * N * N + 4 * N * in_itemsize
    budget = int(vmem_limit * 0.8) - fixed_bytes
    max_td = max(1, budget // per_td)
    if D <= max_td:
        return D
    td = (min(D, max_td) // sub_mult) * sub_mult
    while td >= sub_mult and D % td != 0:
        td -= sub_mult
    return td if td >= sub_mult else D


def _build_selectors(mask2d_bool, N, dtype):
    # rowsel[i, i'*N + j] = (i == i') * mask[i', j]
    # colsel[jj, i*N + j] = (jj == j) * mask[i, j]
    m = mask2d_bool.astype(dtype)
    eye = jnp.eye(N, dtype=dtype)
    rowsel = (eye[:, :, None] * m[None, :, :]).reshape(N, N * N)
    colsel = (eye[:, None, :] * m[None, :, :]).reshape(N, N * N)
    return rowsel, colsel


# ----------------------------------------------------------------------------
# pallas_call wrappers
# ----------------------------------------------------------------------------

def _pallas_dense(start, end, mask2d_bool, out_dtype):
    B, D, N = start.shape
    in_dt = start.dtype
    isz = jnp.dtype(in_dt).itemsize
    osz = jnp.dtype(out_dtype).itemsize
    vmem_limit = _vmem_limit_bytes()
    sub_mult = {4: 8, 2: 16, 1: 32}.get(osz, 8)
    tD = _choose_tile_d(D, N, isz, osz, vmem_limit, 2 * N * N * isz, sub_mult)
    mask_f = mask2d_bool.astype(in_dt)

    out = pl.pallas_call(
        _dense_kernel,
        out_shape=jax.ShapeDtypeStruct((B, 2, D, N, N), out_dtype),
        grid_spec=pltpu.PrefetchScalarGridSpec(
            num_scalar_prefetch=0,
            grid=(B, D // tD),
            in_specs=[
                pl.BlockSpec((1, tD, N), lambda b, d: (b, d, 0)),
                pl.BlockSpec((1, tD, N), lambda b, d: (b, d, 0)),
                pl.BlockSpec((N, N), lambda b, d: (0, 0)),
            ],
            # NOTE: pipeline_mode=pl.Buffered(3) is an option here if the
            # writeback DMA ever shows up exposed in profiles.
            out_specs=pl.BlockSpec((1, 2, tD, N, N),
                                   lambda b, d: (b, 0, d, 0, 0)),
        ),
        compiler_params=pltpu.CompilerParams(
            dimension_semantics=("parallel", "parallel"),
            vmem_limit_bytes=vmem_limit,
        ),
        cost_estimate=pl.CostEstimate(
            flops=4 * B * D * N * N,
            transcendentals=0,
            bytes_accessed=(2 * B * D * N * N * osz
                            + 2 * B * D * N * isz + N * N * isz),
        ),
    )(start, end, mask_f)
    return out.reshape(B, 2 * D, N, N)


def _pallas_flat(start, end, mask2d_bool, out_dtype):
    B, D, N = start.shape
    in_dt = start.dtype
    isz = jnp.dtype(in_dt).itemsize
    osz = jnp.dtype(out_dtype).itemsize
    vmem_limit = _vmem_limit_bytes()
    sub_mult = {4: 8, 2: 16, 1: 32}.get(osz, 8)
    sel_bytes = 4 * N * N * N * isz           # two double-buffered selectors
    tD = _choose_tile_d(D, N, isz, osz, vmem_limit, sel_bytes, sub_mult)
    rowsel, colsel = _build_selectors(mask2d_bool, N, in_dt)

    out = pl.pallas_call(
        _flat_kernel,
        out_shape=jax.ShapeDtypeStruct((B, 2, D, N * N), out_dtype),
        grid_spec=pltpu.PrefetchScalarGridSpec(
            num_scalar_prefetch=0,
            grid=(B, D // tD),
            in_specs=[
                pl.BlockSpec((1, tD, N), lambda b, d: (b, d, 0)),
                pl.BlockSpec((1, tD, N), lambda b, d: (b, d, 0)),
                pl.BlockSpec((N, N * N), lambda b, d: (0, 0)),
                pl.BlockSpec((N, N * N), lambda b, d: (0, 0)),
            ],
            out_specs=pl.BlockSpec((1, 2, tD, N * N),
                                   lambda b, d: (b, 0, d, 0)),
        ),
        compiler_params=pltpu.CompilerParams(
            dimension_semantics=("parallel", "parallel"),
            vmem_limit_bytes=vmem_limit,
        ),
        cost_estimate=pl.CostEstimate(
            flops=4 * B * D * N * N * N,
            transcendentals=0,
            bytes_accessed=(2 * B * D * N * N * osz
                            + 2 * B * D * N * isz + 2 * N * N * N * isz),
        ),
    )(start, end, rowsel, colsel)
    return out.reshape(B, 2 * D, N, N)


def sparse_boundary_cat_pallas(start, end, mask2d_bool, *, out_dtype=None):
    """Pallas forward: returns (map2d, mask2d) matching the PyTorch module."""
    assert start.shape == end.shape, "start/end shape mismatch"
    assert start.dtype == end.dtype, "start/end dtype mismatch"
    B, D, N = start.shape
    out_dtype = start.dtype if out_dtype is None else jnp.dtype(out_dtype)
    if N % 128 == 0:
        map2d = _pallas_dense(start, end, mask2d_bool, out_dtype)
    else:
        map2d = _pallas_flat(start, end, mask2d_bool, out_dtype)
    return map2d, mask2d_bool


def reference(start, end, mask2d_bool):
    """Pure-JAX reference of the PyTorch forward for validation."""
    m = mask2d_bool[None, None, :, :]
    s_map = jnp.where(m, start[:, :, :, None], 0.0).astype(start.dtype)
    e_map = jnp.where(m, end[:, :, None, :], 0.0).astype(end.dtype)
    return jnp.concatenate([s_map, e_map], axis=1)


def sparse_boundary_cat(start, end, mask2d_bool, *, out_dtype=None,
                        min_out_bytes=1 << 20):
    """Dispatcher: tiny problems are dominated by launch / per-step overhead,
    so below the byte threshold a fused XLA expression is used instead."""
    B, D, N = start.shape
    odt = start.dtype if out_dtype is None else jnp.dtype(out_dtype)
    if 2 * B * D * N * N * jnp.dtype(odt).itemsize < min_out_bytes:
        return reference(start, end, mask2d_bool).astype(odt), mask2d_bool
    return sparse_boundary_cat_pallas(start, end, mask2d_bool,
                                      out_dtype=out_dtype)


if __name__ == "__main__":
    key = jax.random.PRNGKey(0)
    k1, k2, k3, k4 = jax.random.split(key, 4)

    # --- Small shapes consistent with the module: B=2, D=4, N=16 (flat path).
    B, D, N = 2, 4, 16
    pooling_counts = [3, 2]
    mask2d = jnp.asarray(build_mask2d(pooling_counts, N))
    start = jax.random.normal(k1, (B, D, N), dtype=jnp.float32)
    end = jax.random.normal(k2, (B, D, N), dtype=jnp.float32)

    map2d, mask_out = sparse_boundary_cat_pallas(start, end, mask2d)
    map2d = jax.block_until_ready(map2d)
    ref = jax.block_until_ready(reference(start, end, mask2d))
    assert map2d.shape == (B, 2 * D, N, N)
    assert mask_out.dtype == jnp.bool_
    np.testing.assert_allclose(np.asarray(map2d), np.asarray(ref),
                               rtol=1e-4, atol=1e-6)

    # --- Lane-aligned N exercises the dense (broadcast-multiply) path.
    B2, D2, N2 = 1, 8, 128
    mask2d_b = jnp.asarray(build_mask2d([4, 3], N2))
    start2 = jax.random.normal(k3, (B2, D2, N2), dtype=jnp.float32)
    end2 = jax.random.normal(k4, (B2, D2, N2), dtype=jnp.float32)
    map2d_b, _ = sparse_boundary_cat_pallas(start2, end2, mask2d_b)
    map2d_b = jax.block_until_ready(map2d_b)
    ref2 = jax.block_until_ready(reference(start2, end2, mask2d_b))
    np.testing.assert_allclose(np.asarray(map2d_b), np.asarray(ref2),
                               rtol=1e-6, atol=1e-6)

    print("KERNEL_OK")
</pallas_src>

<mosaic_0001>
module attributes {stable_mosaic.version = 11 : i64} {
  func.func @_flat_kernel(%arg0: i32, %arg1: i32, %arg2: memref<1x4x16xf32, #tpu.memory_space<vmem>>, %arg3: memref<1x4x16xf32, #tpu.memory_space<vmem>>, %arg4: memref<16x256xf32, #tpu.memory_space<vmem>>, %arg5: memref<16x256xf32, #tpu.memory_space<vmem>>, %arg6: memref<1x2x4x256xf32, #tpu.memory_space<vmem>>) attributes {dimension_semantics = [#tpu.dimension_semantics<parallel>, #tpu.dimension_semantics<parallel>], iteration_bounds = array<i64: 2, 1>, scalar_prefetch = 0 : i64, scratch_operands = 0 : i64, tpu.core_type = #tpu.core_type<tc>, window_params = [{transform_indices = @transform_0, window_bounds = array<i64: 1, 4, 16>}, {transform_indices = @transform_1, window_bounds = array<i64: 1, 4, 16>}, {pipeline_mode = #tpu.pipeline_mode<synchronous>, transform_indices = @transform_2, window_bounds = array<i64: 16, 256>}, {pipeline_mode = #tpu.pipeline_mode<synchronous>, transform_indices = @transform_3, window_bounds = array<i64: 16, 256>}, {transform_indices = @transform_4, window_bounds = array<i64: 1, 2, 4, 256>}]} {
    %c0 = arith.constant 0 : index
    %c0_0 = arith.constant 0 : index
    %c0_1 = arith.constant 0 : index
    %0 = vector.load %arg2[%c0, %c0_0, %c0_1] : memref<1x4x16xf32, #tpu.memory_space<vmem>>, vector<1x4x16xf32>
    %1 = vector.shape_cast %0 : vector<1x4x16xf32> to vector<4x16xf32>
    %c0_2 = arith.constant 0 : index
    %c0_3 = arith.constant 0 : index
    %c0_4 = arith.constant 0 : index
    %2 = vector.load %arg3[%c0_2, %c0_3, %c0_4] : memref<1x4x16xf32, #tpu.memory_space<vmem>>, vector<1x4x16xf32>
    %3 = vector.shape_cast %2 : vector<1x4x16xf32> to vector<4x16xf32>
    %c0_5 = arith.constant 0 : index
    %c0_6 = arith.constant 0 : index
    %4 = vector.load %arg4[%c0_5, %c0_6] : memref<16x256xf32, #tpu.memory_space<vmem>>, vector<16x256xf32>
    %cst = arith.constant dense<0.000000e+00> : vector<4x256xf32>
    %5 = tpu.matmul %1, %4, %cst {dimension_numbers = #tpu.dot_dimension_numbers<[1], [0], [0], [1], [0, 0, 1, 1], [], []>, precision = #tpu.contract_precision<fp32>} : vector<4x16xf32>, vector<16x256xf32>, vector<4x256xf32> -> vector<4x256xf32>
    %c0_7 = arith.constant 0 : index
    %c0_8 = arith.constant 0 : index
    %6 = vector.load %arg5[%c0_7, %c0_8] : memref<16x256xf32, #tpu.memory_space<vmem>>, vector<16x256xf32>
    %cst_9 = arith.constant dense<0.000000e+00> : vector<4x256xf32>
    %7 = tpu.matmul %3, %6, %cst_9 {dimension_numbers = #tpu.dot_dimension_numbers<[1], [0], [0], [1], [0, 0, 1, 1], [], []>, precision = #tpu.contract_precision<fp32>} : vector<4x16xf32>, vector<16x256xf32>, vector<4x256xf32> -> vector<4x256xf32>
    %c0_10 = arith.constant 0 : index
    %c0_11 = arith.constant 0 : index
    %c0_12 = arith.constant 0 : index
    %c0_13 = arith.constant 0 : index
    %8 = vector.load %arg6[%c0_10, %c0_11, %c0_12, %c0_13] : memref<1x2x4x256xf32, #tpu.memory_space<vmem>>, vector<1x1x4x256xf32>
    %9 = vector.shape_cast %8 : vector<1x1x4x256xf32> to vector<4x256xf32>
    %10 = vector.shape_cast %5 : vector<4x256xf32> to vector<1x1x4x256xf32>
    tpu.vector_store %arg6[%c0_10, %c0_11, %c0_12, %c0_13], %10 {strides = array<i32>} : memref<1x2x4x256xf32, #tpu.memory_space<vmem>>, vector<1x1x4x256xf32>,
    %c0_14 = arith.constant 0 : index
    %c1 = arith.constant 1 : index
    %c0_15 = arith.constant 0 : index
    %c0_16 = arith.constant 0 : index
    %11 = vector.load %arg6[%c0_14, %c1, %c0_15, %c0_16] : memref<1x2x4x256xf32, #tpu.memory_space<vmem>>, vector<1x1x4x256xf32>
    %12 = vector.shape_cast %11 : vector<1x1x4x256xf32> to vector<4x256xf32>
    %13 = vector.shape_cast %7 : vector<4x256xf32> to vector<1x1x4x256xf32>
    tpu.vector_store %arg6[%c0_14, %c1, %c0_15, %c0_16], %13 {strides = array<i32>} : memref<1x2x4x256xf32, #tpu.memory_space<vmem>>, vector<1x1x4x256xf32>,
    return
  }
  func.func @transform_0(%arg0: i32, %arg1: i32) -> (i32, i32, i32) {
    %c0_i32 = arith.constant 0 : i32
    %c0_i32_0 = arith.constant 0 : i32
    return %arg0, %arg1, %c0_i32 : i32, i32, i32
  }
  func.func @transform_1(%arg0: i32, %arg1: i32) -> (i32, i32, i32) {
    %c0_i32 = arith.constant 0 : i32
    %c0_i32_0 = arith.constant 0 : i32
    return %arg0, %arg1, %c0_i32 : i32, i32, i32
  }
  func.func @transform_2(%arg0: i32, %arg1: i32) -> (i32, i32) {
    %c0_i32 = arith.constant 0 : i32
    %c0_i32_0 = arith.constant 0 : i32
    %c0_i32_1 = arith.constant 0 : i32
    return %c0_i32, %c0_i32_0 : i32, i32
  }
  func.func @transform_3(%arg0: i32, %arg1: i32) -> (i32, i32) {
    %c0_i32 = arith.constant 0 : i32
    %c0_i32_0 = arith.constant 0 : i32
    %c0_i32_1 = arith.constant 0 : i32
    return %c0_i32, %c0_i32_0 : i32, i32
  }
  func.func @transform_4(%arg0: i32, %arg1: i32) -> (i32, i32, i32, i32) {
    %c0_i32 = arith.constant 0 : i32
    %c0_i32_0 = arith.constant 0 : i32
    %c0_i32_1 = arith.constant 0 : i32
    return %arg0, %c0_i32, %arg1, %c0_i32_0 : i32, i32, i32, i32
  }
}

</mosaic_0001>

<bundles_post_ra>
// kernel: tpu_custom_call.1
= control target key start
LH: loop header
LB: loop body
LE: loop exit
PB: predicated region body
PF: predicated region fallthrough
CT: control target
= control target key end

     0   :  { %s2109_s0 = inlined_call_operand.hbm [shape: f32[2,4,16], index: 0, kind: input, shape index: {}]   ;;  %s2110_s1 = inlined_call_operand.hbm [shape: f32[2,4,16], index: 1, kind: input, shape index: {}]   ;;  %s2111_s2 = inlined_call_operand.hbm [shape: f32[16,256], index: 2, kind: input, shape index: {}]   ;;  %s2112_s3 = inlined_call_operand.hbm [shape: f32[16,256], index: 3, kind: input, shape index: {}]   ;;  %s2113_s4 = inlined_call_operand.hbm [shape: f32[2,2,4,256], index: 4, kind: output, shape index: {}]  }
   0x1   :  { %2115 = sst [smem:[#allocation16_spill]] %s2109_s0 }
   0x2   :  { %2116 = sst [smem:[#allocation17_spill]] %s2110_s1 }
   0x3   :  { %9 = vsyncpa [#allocation3], 0 }
   0x4   :  { %11 = vsyncpa [#allocation3 + $0x1], 0 }
   0x5   :  { %12 = vsyncpa [#allocation6], 0 }
   0x6   :  { %14 = vsyncpa [#allocation6 + $0x1], 0 }
   0x7   :  { %15 = vsyncpa [#allocation9], 0 }
   0x8   :  { %16 = vsyncpa [#allocation4], 0 }
   0x9   :  { %18 = vsyncpa [#allocation4 + $0x1], 0  ;;  %s1806_s15 = smov 0   ;;  %s1808_s16 = smov 0  }
   0xa   :  { %s1810_s17 = smov 0   ;;  %s1812_s18 = smov 0  }
   0xb   :  { %s1814_s19 = smov 0   ;;  %s1816_s20 = smov 0  }
   0xc LB: > { %s1837_s21 = sadd.s32 4294967295, %s1769_s20   ;;  %s1454_s22 = sadd.s32 4294967294, %s1769_s20   ;;  %s1769_s20 = sphi %s1816_s20, %s24_s20   ;;  %s1765_s19 = sphi %s1814_s19, %s2136_s19   ;;  %s1761_s18 = sphi %s1812_s18, %s2135_s18   ;;  %s1757_s17 = sphi %s1810_s17, %s2134_s17   ;;  %s1753_s16 = sphi %s1808_s16, %s2133_s16   ;;  %s1749_s15 = sphi %s1806_s15, %s2132_s15  }
   0xd   : > { %p58_p0 = scmp.ne.s32.totalorder %s1753_s16, %s1749_s15  ;;  %p2114_p1 = scmp.eq.s32.totalorder %s1837_s21, 0 }
   0xe   : > { %p160_p3 = scmp.eq.s32.totalorder %s1454_s22, 1  ;;  %p1455_p5 = scmp.ge.s32.totalorder %s1769_s20, 1 }
   0xf   : > { %p1846_p4 = por %p2114_p1, %p58_p0  ;;  %p167_p7 = scmp.lt.s32.totalorder %s1769_s20, 3 }
  0x10   : > { %p1851_p6 = por %p160_p3, %p58_p0  ;;  %s1771_s26 = smov [#allocation7]  }
  0x11   : > { %p1856_p8 = pnand %p1455_p5, %p167_p7  ;;  %s179_s27 = sshll.u32 %s1771_s26, 4  ;;  %s180_s27 = int_to_ptr.vmem [resolvable:$true] %s179_s27 }
  0x12   : > { %s2118_s24 = scalar_select %p1851_p6, 1, 0 }
  0x13   : > { %p1490_p9 = pneg %p1856_p8  ;;  %s1772_s29 = smov [#allocation8]  }
  0x14   : > { %s192_s30 = sshll.u32 %s1772_s29, 4  ;;  %s1580_s5 = scalar_lea.vmem %s180_s27, 512  ;;  %s193_s30 = int_to_ptr.vmem [resolvable:$true] %s192_s30 }
  0x15   : > { %p1865_p11 = pnand %p1490_p9, %p2114_p1  ;;  %p1581_p13 = scmp.ne.s32.totalorder %s180_s27, %s1580_s5 }
  0x16   : > { %p1588_p5 = scmp.lt.s32.totalorder %s180_s27, %s180_s27  ;;  %p1589_p7 = scmp.lt.s32.totalorder %s1580_s5, %s1580_s5 }
  0x17   : > { %p1571_p12 = pneg %p1865_p11 }
  0x18   : > { %p1590_p10 = por %p1589_p7, %p1588_p5 }
  0x19   : > { %p1583_p0 = pnand %p1581_p13, %p1571_p12 }
  0x1b   : > { %p1584_p3 = pneg %p1583_p0 }
  0x1d   : > { %p1591_p9 = pnand %p1590_p10, %p1584_p3 }
  0x1f   : > { %1594 = shalt.err (!%p1591_p9)
}
  0x20   : > { %s1773_s6 = smov 256   ;;  %s1774_s7 = smov 16  }
  0x21   : > { %1493 = dma.hbm_to_vmem [thread:$0]  (!%p1865_p11), %s2111_s2, 512, %s180_s27, [#allocation6], %s1773_s6, %s1773_s6, %s1774_s7  }
  0x22   : > { %s1606_s10 = scalar_lea.vmem %s193_s30, 512  ;;  %p1614_p2 = scmp.lt.s32.totalorder %s193_s30, %s193_s30 }
  0x23   : > { %p1607_p1 = scmp.ne.s32.totalorder %s193_s30, %s1606_s10  ;;  %p1615_p6 = scmp.lt.s32.totalorder %s1606_s10, %s1606_s10 }
  0x25   : > { %p1609_p13 = pnand %p1607_p1, %p1571_p12  ;;  %p1616_p5 = por %p1615_p6, %p1614_p2 }
  0x27   : > { %p1610_p0 = pneg %p1609_p13 }
  0x29   : > { %p1617_p10 = pnand %p1616_p5, %p1610_p0 }
  0x2b   : > { %1620 = shalt.err (!%p1617_p10)
}
  0x2c   : > { %1496 = dma.hbm_to_vmem [thread:$0]  (!%p1865_p11), %s2112_s3, 512, %s193_s30, [#allocation9], %s1773_s6, %s1773_s6, %s1774_s7  }
  0x2d   : > { %s36_s13 = sadd.s32 1, %s1765_s19  ;;  %s45_s14 = sadd.s32 1, %s1757_s17 }
  0x2e   : > { %p38_p1 = scmp.ge.s32.totalorder %s36_s13, 2  ;;  %p52_p2 = scmp.ne.s32.totalorder %s1757_s17, %s1753_s16 }
  0x2f   : > { %p53_p6 = scmp.eq.s32.totalorder %s1769_s20, 0  ;;  %p1510_p12 = scmp.lt.s32.totalorder %s1769_s20, 2 }
  0x30   : > { %s2138_s13 = smov (%p38_p1, %s36_s13), 0  ;;  %p2121_p7 = scmp.eq.s32.totalorder %s1837_s21, 1 }
  0x31   : > { %p54_p3 = por %p53_p6, %p52_p2  ;;  %s40_s26 = ssub.s32 %s1765_s19, %s2138_s13 }
  0x32   : > { %p1897_p9 = por %p2121_p7, %p52_p2  ;;  %s206_s27 = sand.u32 1, %s1757_s17  }
  0x33   : > { %p43_p13 = scmp.eq.s32.totalorder %s40_s26, 0  ;;  %s1459_s28 = sshll.u32 %s206_s27, 2 }
  0x34   : > { %s1460_s29 = sshll.u32 %s1765_s19, 6  ;;  %s2123_s0 = sld [smem:[#allocation16_spill]] }
  0x35   : > { %s1906_s30 = scalar_select %p43_p13, %s1757_s17, %s45_s14  }
  0x36   : > { %s210_s8 = scalar_lea.vmem [#allocation2], %s1459_s28  ;;  %p1913_p11 = pnand %p1510_p12, %p54_p3 }
  0x37   : > { %s218_s9 = sshll.u32 %s210_s8, 4  ;;  %s2125_s1 = sld [smem:[#allocation17_spill]]  ;;  %s219_s9 = int_to_ptr.vmem [resolvable:$true] %s218_s9 }
  0x38   : > { %s207_s14 = scalar_lea.sflag [#allocation3], %s206_s27  ;;  %p1623_p0 = pneg %p1913_p11 }
  0x39   : > { %s1634_s5 = scalar_lea.vmem %s219_s9, 64  ;;  %s1775_s6 = smov [#allocation2]  }
  0x3a   : > { %s216_s7 = scalar_lea.hbm %s2123_s0, %s1460_s29  ;;  %p1635_p5 = scmp.ne.s32.totalorder %s219_s9, %s1634_s5 }
  0x3b   : > { %s1639_s8 = sshll.u32 %s1775_s6, 4  ;;  %s1640_s8 = int_to_ptr.vmem [resolvable:$false] %s1639_s8 }
  0x3c   : > { %p1637_p10 = pnand %p1635_p5, %p1623_p0  ;;  %s1641_s0 = scalar_lea.vmem %s1640_s8, 128 }
  0x3d   : > { %s1920_s26 = scalar_lea.hbm %s2125_s1, %s1460_s29  ;;  %p1642_p2 = scmp.lt.s32.totalorder %s219_s9, %s1640_s8 }
  0x3e   : > { %p1638_p1 = pneg %p1637_p10  ;;  %p1643_p6 = scmp.lt.s32.totalorder %s1641_s0, %s1634_s5 }
  0x40   : > { %p1644_p12 = por %p1643_p6, %p1642_p2 }
  0x42   : > { %p1645_p3 = pnand %p1644_p12, %p1638_p1 }
  0x44   : > { %1648 = shalt.err (!%p1645_p3)
}
  0x45   : > { %1500 = dma.hbm_to_vmem [thread:$0]  (!%p1913_p11), %s216_s7, 64, %s219_s9, %s207_s14  }
  0x46   : > { %s225_s27 = sand.u32 1, %s1769_s20   ;;  %s229_s29 = scalar_lea.vmem [#allocation5], %s1459_s28 }
  0x47   : > { %s237_s11 = sshll.u32 %s229_s29, 4  ;;  %s226_s12 = scalar_lea.sflag [#allocation6], %s225_s27  ;;  %s238_s11 = int_to_ptr.vmem [resolvable:$true] %s237_s11 }
  0x48   : > { %s1662_s1 = scalar_lea.vmem %s238_s11, 64  ;;  %s1776_s0 = smov [#allocation5]  }
  0x49   : > { %p1663_p7 = scmp.ne.s32.totalorder %s238_s11, %s1662_s1  ;;  %s1667_s5 = sshll.u32 %s1776_s0, 4  ;;  %s1668_s5 = int_to_ptr.vmem [resolvable:$false] %s1667_s5 }
  0x4a   : > { %s1669_s6 = scalar_lea.vmem %s1668_s5, 128  ;;  %p1670_p10 = scmp.lt.s32.totalorder %s238_s11, %s1668_s5 }
  0x4b   : > { %p1665_p13 = pnand %p1663_p7, %p1623_p0  ;;  %p1671_p1 = scmp.lt.s32.totalorder %s1669_s6, %s1662_s1 }
  0x4d   : > { %p1666_p5 = pneg %p1665_p13  ;;  %p1672_p2 = por %p1671_p1, %p1670_p10 }
  0x4f   : > { %p1673_p6 = pnand %p1672_p2, %p1666_p5 }
  0x51   : > { %1676 = shalt.err (!%p1673_p6)
}
  0x52   : > { %1503 = dma.hbm_to_vmem [thread:$0]  (!%p1913_p11), %s1920_s26, 64, %s238_s11, %s226_s12  }
  0x53   : > { %246 = sbr.rel (%p1856_p8) target bundleno = 356 (0x164), region = 36  ;;  %s1939_s28 = sand.u32 (!%p1856_p8), 1, %s1753_s16  }
  0x54   : > { %s1464_s7 = sshll.u32 (!%p1856_p8), %s1939_s28, 2  ;;  %s249_s9 = scalar_lea.sflag (!%p1856_p8), [#allocation3], %s1939_s28 }
  0x55   : > { %s252_s14 = scalar_lea.vmem (!%p1856_p8), [#allocation2], %s1464_s7 }
  0x58   : > { %1728 = dma.done.wait (%p1846_p4), %s249_s9, 64  }
  0x59   : > { %1730 = vsyncadd (%p1846_p4), %s249_s9, 4294967232  ;;  %s257_s1 = sand.u32 1, %s1837_s21   ;;  %s261_s25 = scalar_lea.vmem [#allocation5], %s1464_s7 }
  0x5a   : > { %s258_s10 = scalar_lea.sflag [#allocation6], %s257_s1 }
  0x5b   : > { %1732 = dma.done.wait (%p1846_p4), %s258_s10, 64  }
  0x5c   : > { %1734 = vsyncadd (%p1846_p4), %s258_s10, 4294967232  ;;  %p2126_p8 = scmp.eq.s32.totalorder %s1837_s21, 0 }
  0x5e   : > { %1736 = dma.done.wait (%p2126_p8), [#allocation6], 512   ;;  %p2127_p11 = pmov %p2126_p8 }
  0x5f   : > { %p2128_p0 = pmov %p2126_p8 }
  0x60   : > { %1738 = vsyncadd (%p2127_p11), [#allocation6], 4294966784 }
  0x61   : > { %1740 = dma.done.wait (%p2128_p0), [#allocation9], 512   ;;  %p2129_p12 = pmov %p2128_p0 }
  0x62   : > { %v1777_v0 = vmov 0.0   ;;  %vm305_vm0 = vcmask 130048   ;;  %v304_v1 = vld [vmem:[#allocation7 + $0x18] sm:$0xff]  ;;  %v303_v2 = vld [vmem:[#allocation7 + $0x10] sm:$0xff]  ;;  %v302_v3 = vld [vmem:[#allocation7 + $0x8] sm:$0xff]  ;;  %s1468_s21 = sshll.u32 %s1939_s28, 4 }
  0x63   : > { %1742 = vsyncadd (%p2129_p12), [#allocation9], 4294966784  ;;  %377 = vmatprep.mubr.f32.mxu0 %v1777_v0  ;;  %473 = vmatprep.mubr.f32.mxu1 %v1777_v0  ;;  %v1962_v4 = vand.u32 4294901760, %v304_v1  ;;  %v1964_v5 = vand.u32 4294901760, %v303_v2  ;;  %v1966_v6 = vand.u32 4294901760, %v302_v3  ;;  %v301_v7 = vld [vmem:[#allocation7] sm:$0xff] }
  0x64   : > { %v299_v8 = vld [vmem:[%s252_s14] sm:$0xf]  ;;  %v1968_v9 = vand.u32 4294901760, %v301_v7  ;;  %v300_v10 = vld [vmem:[%s261_s25] sm:$0xf]  ;;  %v801_v31 = vld [vmem:[#allocation8 + $0x8] sm:$0xff] }
  0x65   : > { %v307_v11 = vsel %vm305_vm0, %v299_v8, 0  ;;  %338 = vmatprep.subr.mxu0 %v1962_v4  ;;  %v418_v12 = vsub.f32 %v304_v1, %v1962_v4  ;;  %v424_v14 = vsub.f32 %v303_v2, %v1964_v5  ;;  %v430_v15 = vsub.f32 %v302_v3, %v1966_v6  ;;  %v803_v23 = vld [vmem:[#allocation8 + $0x18] sm:$0xff]  ;;  %v802_v27 = vld [vmem:[#allocation8 + $0x10] sm:$0xff]  ;;  %v800_v36 = vld [vmem:[#allocation8] sm:$0xff]  ;;  %s298_s23 = scalar_lea.vmem [#allocation10], %s1468_s21  ;;  %s1475_s8 = sshll.u32 %s1761_s18, 8 }
  0x66   : > { %v1973_v13 = vand.u32 4294901760, %v307_v11  ;;  %340 = vmatpush1.msra.mxu0 %v1964_v5  ;;  %v436_v16 = vsub.f32 %v301_v7, %v1968_v9  ;;  %v805_v19 = vsel %vm305_vm0, %v300_v10, 0  ;;  %v1985_v35 = vand.u32 4294901760, %v803_v23  ;;  %s1325_s26 = sshll.u32 %s298_s23, 4  ;;  %s2061_s11 = scalar_lea.hbm %s2113_s4, %s1475_s8  ;;  %s2056_s26 = int_to_ptr.vmem [resolvable:$true] %s1325_s26 }
  0x67   : > { %342 = vmatprep.subr.mxu0 %v1966_v6  ;;  %v419_v17 = vand.u32 4294901760, %v418_v12  ;;  %v425_v20 = vand.u32 4294901760, %v424_v14  ;;  %v431_v21 = vand.u32 4294901760, %v430_v15  ;;  %v1983_v28 = vand.u32 4294901760, %v805_v19  ;;  %s1310_s12 = scalar_lea.sflag [#allocation4], %s1939_s28  ;;  %s1677_s0 = scalar_lea.vmem %s2056_s26, 256 }
  0x68   : > { %v379_v18 = vsub.f32 %v307_v11, %v1973_v13  ;;  %344 = vmatpush1.msra.mxu0 %v1968_v9  ;;  %v437_v22 = vand.u32 4294901760, %v436_v16  ;;  %v1987_v39 = vand.u32 4294901760, %v802_v27  ;;  %v1989_v41 = vand.u32 4294901760, %v801_v31  ;;  %p1678_p4 = scmp.ne.s32.totalorder %s2056_s26, %s1677_s0  ;;  %s1778_s18 = smov [#allocation10]  }
  0x69   : > { %v420_v24 = vsub.f32 %v418_v12, %v419_v17  ;;  %v426_v26 = vsub.f32 %v424_v14, %v425_v20  ;;  %511 = vmatprep.subr.mxu0 %v418_v12  ;;  %v432_v29 = vsub.f32 %v430_v15, %v431_v21  ;;  %v1991_v42 = vand.u32 4294901760, %v800_v36  ;;  %s1681_s5 = sshll.u32 %s1778_s18, 4  ;;  %s1682_s5 = int_to_ptr.vmem [resolvable:$false] %s1681_s5 }
  0x6a   : > { %v380_v25 = vand.u32 4294901760, %v379_v18  ;;  %v438_v30 = vsub.f32 %v436_v16, %v437_v22  ;;  %v1994_v43 = vsub.f32 %v803_v23, %v1985_v35  ;;  %v1997_v44 = vsub.f32 %v805_v19, %v1983_v28  ;;  %p1679_p3 = pnand %p1678_p4, %p1897_p9  ;;  %s1683_s6 = scalar_lea.vmem %s1682_s5, 512 }
  0x6b   : > { %v421_v32 = vand.u32 4294901760, %v420_v24  ;;  %v427_v34 = vand.u32 4294901760, %v426_v26  ;;  %v433_v37 = vand.u32 4294901760, %v432_v29  ;;  %v2000_v45 = vsub.f32 %v802_v27, %v1987_v39  ;;  %p1684_p13 = scmp.lt.s32.totalorder %s2056_s26, %s1682_s5  ;;  %p1685_p5 = scmp.lt.s32.totalorder %s1683_s6, %s1677_s0 }
  0x6c   : > { %v381_v33 = vsub.f32 %v379_v18, %v380_v25  ;;  %v439_v38 = vand.u32 4294901760, %v438_v30  ;;  %v2004_v46 = vsub.f32 %v801_v31, %v1989_v41  ;;  %v934_v47 = vsub.f32 %v800_v36, %v1991_v42  ;;  %p1680_p7 = pneg %p1679_p3 }
  0x6d   : > { %422 = vmatprep.subr.mxu1 %v421_v32  ;;  %v917_v48 = vand.u32 4294901760, %v1994_v43  ;;  %v878_v49 = vand.u32 4294901760, %v1997_v44  ;;  %v923_v50 = vand.u32 4294901760, %v2000_v45  ;;  %p1686_p10 = por %p1685_p5, %p1684_p13 }
  0x6e   : > { %v382_v40 = vand.u32 4294901760, %v381_v33  ;;  %428 = vmatpush1.msra.mxu1 %v427_v34  ;;  %v929_v51 = vand.u32 4294901760, %v2004_v46  ;;  %v935_v52 = vand.u32 4294901760, %v934_v47 }
  0x6f   : > { %434 = vmatprep.subr.mxu1 %v433_v37  ;;  %v918_v53 = vsub.f32 %v1994_v43, %v917_v48  ;;  %v879_v54 = vsub.f32 %v1997_v44, %v878_v49  ;;  %v924_v55 = vsub.f32 %v2000_v45, %v923_v50  ;;  %p1687_p1 = pnand %p1686_p10, %p1680_p7 }
  0x70   : > { %383 = vmatmul.mubr.f32.vlgmr.msra.gmra.mxu0 %v382_v40  ;;  %440 = vmatpush1.msra.mxu1 %v439_v38  ;;  %v930_v56 = vsub.f32 %v2004_v46, %v929_v51  ;;  %v936_v57 = vsub.f32 %v934_v47, %v935_v52 }
  0x71   : > { %514 = vmatpush1.msra.mxu0 %v424_v14  ;;  %475 = vmatmul.mubr.f32.vlgmr.msra.gmra.mxu1 %v1973_v13  ;;  %v919_v58 = vand.u32 4294901760, %v918_v53  ;;  %v880_v59 = vand.u32 4294901760, %v879_v54  ;;  %v925_v60 = vand.u32 4294901760, %v924_v55 }
  0x72   : > { %517 = vmatprep.subr.mxu0 %v430_v15  ;;  %553 = vmatprep.mubr.f32.mxu0 %v1777_v0  ;;  %v931_v61 = vand.u32 4294901760, %v930_v56  ;;  %v937_v62 = vand.u32 4294901760, %v936_v57 }
  0x73   : > { %520 = vmatpush1.msra.mxu0 %v436_v16  ;;  %591 = vmatprep.subr.mxu1 %v1962_v4 }
  0x74   : > { %556 = vmatmul.mubr.f32.vlgmr.msra.gmra.mxu0 %v379_v18  ;;  %593 = vmatpush1.msra.mxu1 %v1964_v5 }
  0x75   : > { %671 = vmatprep.subr.mxu0 %v419_v17  ;;  %595 = vmatprep.subr.mxu1 %v1966_v6 }
  0x76   : > { %675 = vmatpush1.msra.mxu0 %v425_v20  ;;  %597 = vmatpush1.msra.mxu1 %v1968_v9 }
  0x77   : > { %630 = vmatprep.mubr.f32.mxu1 %v1777_v0  ;;  %679 = vmatprep.subr.mxu0 %v431_v21 }
  0x78   : > { %634 = vmatmul.mubr.f32.vlgmr.msra.gmra.mxu1 %v380_v25  ;;  %683 = vmatpush1.msra.mxu0 %v437_v22 }
  0x79   : > { %716 = vmatprep.mubr.f32.mxu0 %v1777_v0  ;;  %753 = vmatprep.subr.mxu1 %v1962_v4 }
  0x7a   : > { %718 = vmatmul.mubr.f32.vlgmr.msra.gmra.mxu0 %v1973_v13  ;;  %755 = vmatpush1.msra.mxu1 %v1964_v5 }
  0x7b   : > { %836 = vmatprep.subr.mxu0 %v1985_v35  ;;  %757 = vmatprep.subr.mxu1 %v1966_v6 }
  0x7c   : > { %838 = vmatpush1.msra.mxu0 %v1987_v39  ;;  %759 = vmatpush1.msra.mxu1 %v1968_v9 }
  0x7d   : > { %792 = vmatprep.mubr.f32.mxu1 %v1777_v0  ;;  %840 = vmatprep.subr.mxu0 %v1989_v41 }
  0x7e   : > { %794 = vmatmul.mubr.f32.vlgmr.msra.gmra.mxu1 %v1973_v13  ;;  %842 = vmatpush1.msra.mxu0 %v1991_v42 }
  0x7f   : > { %875 = vmatprep.mubr.f32.mxu0 %v1777_v0  ;;  %920 = vmatprep.subr.mxu1 %v919_v58 }
  0x80   : > { %881 = vmatmul.mubr.f32.vlgmr.msra.gmra.mxu0 %v880_v59  ;;  %926 = vmatpush1.msra.mxu1 %v925_v60 }
  0x81   : > { %1009 = vmatprep.subr.mxu0 %v1994_v43  ;;  %932 = vmatprep.subr.mxu1 %v931_v61 }
  0x82   : > { %1012 = vmatpush1.msra.mxu0 %v2000_v45  ;;  %938 = vmatpush1.msra.mxu1 %v937_v62 }
  0x83   : > { %971 = vmatprep.mubr.f32.mxu1 %v1777_v0  ;;  %1015 = vmatprep.subr.mxu0 %v2004_v46 }
  0x84   : > { %973 = vmatmul.mubr.f32.vlgmr.msra.gmra.mxu1 %v1983_v28  ;;  %1018 = vmatpush1.msra.mxu0 %v934_v47 }
  0x85   : > { %1051 = vmatprep.mubr.f32.mxu0 %v1777_v0  ;;  %1089 = vmatprep.subr.mxu1 %v1985_v35 }
  0x86   : > { %1054 = vmatmul.mubr.f32.vlgmr.msra.gmra.mxu0 %v1997_v44  ;;  %1091 = vmatpush1.msra.mxu1 %v1987_v39 }
  0x87   : > { %1169 = vmatprep.subr.mxu0 %v917_v48  ;;  %1093 = vmatprep.subr.mxu1 %v1989_v41 }
  0x88   : > { %1173 = vmatpush1.msra.mxu0 %v923_v50  ;;  %1095 = vmatpush1.msra.mxu1 %v1991_v42 }
  0x89   : > { %1128 = vmatprep.mubr.f32.mxu1 %v1777_v0  ;;  %1177 = vmatprep.subr.mxu0 %v929_v51 }
  0x8a   : > { %1132 = vmatmul.mubr.f32.vlgmr.msra.gmra.mxu1 %v878_v49  ;;  %1181 = vmatpush1.msra.mxu0 %v935_v52 }
  0x8b   : > { %1214 = vmatprep.mubr.f32.mxu0 %v1777_v0  ;;  %1251 = vmatprep.subr.mxu1 %v1985_v35 }
  0x8c   : > { %1216 = vmatmul.mubr.f32.vlgmr.msra.gmra.mxu0 %v1983_v28  ;;  %1253 = vmatpush1.msra.mxu1 %v1987_v39 }
  0x8d   : > { %1290 = vmatprep.mubr.f32.mxu1 %v1777_v0  ;;  %1255 = vmatprep.subr.mxu1 %v1989_v41 }
  0x8e   : > { %1257 = vmatpush1.msra.mxu1 %v1991_v42 }
  0x8f   : > { %1292 = vmatmul.mubr.f32.vlgmr.msra.gmra.mxu1 %v1983_v28 }
 0x130   : > { %v384_v63 = vpop.f32.mrf.mxu0 }
 0x131   : > { %v476_v2 = vpop.f32.mrf.mxu1 }
 0x132   : > { %v386_v1 = vpop.f32.mrf.mxu0  ;;  %v477_v3 = vadd.f32 %v476_v2, %v384_v63 }
 0x133   : > { %v478_v5 = vpop.f32.mrf.mxu1 }
 0x134   : > { %v557_v4 = vpop.f32.mrf.mxu0  ;;  %v479_v7 = vadd.f32 %v478_v5, %v386_v1 }
 0x135   : > { %v558_v6 = vadd.f32 %v557_v4, %v477_v3 }
 0x136   : > { %v559_v8 = vpop.f32.mrf.mxu0 }
 0x137   : > { %v560_v9 = vadd.f32 %v559_v8, %v479_v7 }
 0x138   : > { %v635_v10 = vpop.f32.mrf.mxu1 }
 0x139   : > { %v636_v11 = vadd.f32 %v635_v10, %v558_v6 }
 0x13a   : > { %v719_v0 = vpop.f32.mrf.mxu0  ;;  %v637_v12 = vpop.f32.mrf.mxu1 }
 0x13b   : > { %v638_v13 = vadd.f32 %v637_v12, %v560_v9  ;;  %v720_v15 = vadd.f32 %v719_v0, %v636_v11 }
 0x13c   : > { %v721_v14 = vpop.f32.mrf.mxu0 }
 0x13d   : > { %v722_v16 = vadd.f32 %v721_v14, %v638_v13 }
 0x13e   : > { %v795_v17 = vpop.f32.mrf.mxu1 }
 0x13f   : > { %v796_v20 = vadd.f32 %v795_v17, %v720_v15 }
 0x140   : > { %v882_v18 = vpop.f32.mrf.mxu0  ;;  %v797_v19 = vpop.f32.mrf.mxu1 }
 0x141   : > { %v798_v21 = vadd.f32 %v797_v19, %v722_v16 }
 0x142   : > { %v884_v22 = vpop.f32.mrf.mxu0 }
 0x143   : > { %v1300_v23 = vcombine.low %v796_v20, %v798_v21 }
 0x144   : > { %v974_v24 = vpop.f32.mrf.mxu1 }
 0x145   : > { %1302 = vst [vmem:[%s298_s23] sm:$0xff] %v1300_v23  ;;  %v975_v25 = vadd.f32 %v974_v24, %v882_v18 }
 0x146   : > { %v1055_v26 = vpop.f32.mrf.mxu0  ;;  %v976_v27 = vpop.f32.mrf.mxu1 }
 0x147   : > { %v1056_v28 = vadd.f32 %v1055_v26, %v975_v25  ;;  %v977_v29 = vadd.f32 %v976_v27, %v884_v22 }
 0x148   : > { %v1057_v30 = vpop.f32.mrf.mxu0 }
 0x149   : > { %v1058_v31 = vadd.f32 %v1057_v30, %v977_v29 }
 0x14a   : > { %v1133_v32 = vpop.f32.mrf.mxu1 }
 0x14b   : > { %v1134_v33 = vadd.f32 %v1133_v32, %v1056_v28 }
 0x14c   : > { %v1217_v34 = vpop.f32.mrf.mxu0  ;;  %v1135_v35 = vpop.f32.mrf.mxu1 }
 0x14d   : > { %v1136_v36 = vadd.f32 %v1135_v35, %v1058_v31  ;;  %v1218_v38 = vadd.f32 %v1217_v34, %v1134_v33 }
 0x14e   : > { %v1219_v37 = vpop.f32.mrf.mxu0 }
 0x14f   : > { %v1220_v39 = vadd.f32 %v1219_v37, %v1136_v36  ;;  %v1293_v40 = vpop.f32.mrf.mxu1 }
 0x150   : > { %v1294_v42 = vadd.f32 %v1293_v40, %v1218_v38 }
 0x151   : > { %v1295_v41 = vpop.f32.mrf.mxu1 }
 0x152   : > { %v1296_v43 = vadd.f32 %v1295_v41, %v1220_v39 }
 0x154   : > { %v1305_v44 = vcombine.low %v1294_v42, %v1296_v43 }
 0x156   : > { %1469 = vst [vmem:[%s298_s23 + $0x8] sm:$0xff] %v1305_v44 }
 0x157   : > { %1690 = shalt.err (!%p1687_p1)
}
 0x158   : > { %s1691_s7 = scalar_lea.hbm %s2061_s11, 256  ;;  %s1695_s1 = scalar_lea.hbm %s2113_s4, 512 }
 0x159   : > { %p1692_p2 = scmp.ne.s32.totalorder %s2061_s11, %s1691_s7  ;;  %p1696_p11 = scmp.lt.s32.totalorder %s2061_s11, %s2113_s4 }
 0x15a   : > { %p1697_p0 = scmp.lt.s32.totalorder %s1695_s1, %s1691_s7 }
 0x15b   : > { %p1693_p6 = pnand %p1692_p2, %p1897_p9 }
 0x15c   : > { %p1698_p12 = por %p1697_p0, %p1696_p11 }
 0x15d   : > { %p1694_p8 = pneg %p1693_p6 }
 0x15f   : > { %p1699_p4 = pnand %p1698_p12, %p1694_p8 }
 0x161   : > { %1702 = shalt.err (!%p1699_p4)
}
 0x162   : > { %s1779_s21 = smov 128   ;;  %s1780_s23 = smov 8  }
 0x163   : > { %1488 = dma.vmem_to_hbm [thread:$0]  (%p1897_p9), %s2056_s26, 256, %s2061_s11, %s1310_s12, %s1779_s21, %s1779_s21, %s1780_s23  }
 0x164 PF: > { %s1340_s8 = sand.u32 1, %s1749_s15   ;;  %p2130_p3 = scmp.ne.s32.totalorder %s2118_s24, 0 }
 0x165   : > { %p2131_p7 = scmp.ge.s32.totalorder %s1769_s20, 2  ;;  %s1341_s27 = scalar_lea.sflag [#allocation4], %s1340_s8 }
 0x167   : > { %p1505_p13 = pnand %p2131_p7, %p2130_p3 }
 0x169   : > { %p1506_p5 = pneg %p1505_p13 }
 0x16b   : > { %1744 = dma.done.wait (%p1506_p5), %s1341_s27, 256  }
 0x16c   : > { %1746 = vsyncadd (%p1506_p5), %s1341_s27, 4294967040  ;;  %s24_s20 = sadd.s32 1, %s1769_s20   ;;  %s2132_s15 = smov %s1753_s16 }
 0x16d   : > { %p21_p10 = scmp.ge.s32.totalorder %s24_s20, 4   ;;  %s2133_s16 = smov %s1757_s17 }
 0x16e   : > { %s2134_s17 = smov %s1906_s30  ;;  %s2135_s18 = smov %s1765_s19 }
 0x16f   : > { %s2136_s19 = smov %s2138_s13  ;;  %23 = sbr.rel (!%p21_p10) target bundleno = 12 (0xc), region = 103 }
 0x174   :  { %1346 = vsyncpa [#allocation3], 1 }
 0x175   :  { %1348 = vsyncpa [#allocation3 + $0x1], 1 }
 0x176   :  { %1349 = vsyncpa [#allocation6], 1 }
 0x177   :  { %1351 = vsyncpa [#allocation6 + $0x1], 1 }
 0x178   :  { %1352 = vsyncpa [#allocation9], 1 }
 0x179   :  { %1353 = vsyncpa [#allocation4], 1 }
 0x17a   :  { %1355 = vsyncpa [#allocation4 + $0x1], 1 }

</bundles_post_ra>
